<compile_context>
chip_gen: v6e
topology: v6e:2x2x1
jax: 0.10.0
libtpu: 0.0.40
codegen_flags: <defaults>
</compile_context>

<pallas_src>
import jax
import jax.numpy as jnp
from jax.experimental import pallas as pl
from jax.experimental.pallas import tpu as pltpu

ACTION_SPACE = 2
SEQ_LEN = 2
STATE_SPACE = 4
IN_DIM = STATE_SPACE * SEQ_LEN          # 8
H1 = 64
H2 = 32
HEADS = 1 + ACTION_SPACE                # fused [q | action_vals] -> 3
LN_EPS = 1e-5

# Column layout of the packed parameter slab (shape (H1, 8) = (64, 8)):
#   col 0: b1 (64)    col 3: b2  (:32)    col 6: [bq | b3] (:3)
#   col 1: g1 (64)    col 4: g2  (:32)    col 7: unused
#   col 2: be1 (64)   col 5: be2 (:32)


def _layernorm_fm(h, gamma, beta):
    """LayerNorm over the feature (sublane) axis 0.  h: (F, Bt); gamma/beta: (F, 1).

    PyTorch nn.LayerNorm semantics: biased variance, eps inside the sqrt.
    Two-pass variance for better numerics (per review)."""
    mu = jnp.mean(h, axis=0, keepdims=True)                 # (1, Bt)
    d = h - mu
    var = jnp.mean(d * d, axis=0, keepdims=True)            # (1, Bt)
    return d * jax.lax.rsqrt(var + LN_EPS) * gamma + beta


def dueling_mlp_kernel(x_ref, w1_ref, w2_ref, wh_ref, p_ref, out_ref):
    x = x_ref[...]                                          # (8, Bt)  feature-major
    p = p_ref[...]                                          # (64, 8)  param slab

    # lin1 -> lnorm1 -> relu
    h = jnp.dot(w1_ref[...], x, preferred_element_type=jnp.float32)   # (64, Bt)
    h = h + p[:, 0:1]
    h = _layernorm_fm(h, p[:, 1:2], p[:, 2:3])
    h = jnp.maximum(h, 0.0)

    # lin2 -> lnorm2 -> relu
    h = jnp.dot(w2_ref[...], h, preferred_element_type=jnp.float32)   # (32, Bt)
    h = h + p[:H2, 3:4]
    h = _layernorm_fm(h, p[:H2, 4:5], p[:H2, 5:6])
    h = jnp.maximum(h, 0.0)

    # fused heads: row 0 = q, rows 1:3 = action_vals.  Lane-dense store.
    heads = jnp.dot(wh_ref[...], h, preferred_element_type=jnp.float32)  # (3, Bt)
    out_ref[...] = heads + p[:HEADS, 6:7]


def _cdiv(a, b):
    return -(-a // b)


def _round_up(n, m):
    return _cdiv(n, m) * m


def _choose_block(B, block_b):
    """Batch (lane) block size.  Full-extent block for tiny batches, otherwise
    a 128-aligned block giving >= 2 grid steps (v7x megacore sharding)."""
    if B < 256:
        return B
    bt = _round_up(_cdiv(B, 2), 128)
    return max(128, min(bt, block_b))


def pack_params(params):
    """One-time packing of the PyTorch-layout params (run only when they change)."""
    (w1, b1, g1, be1, w2, b2, g2, be2, wq, bq, w3, b3) = params
    f32 = lambda a: jnp.asarray(a, jnp.float32)

    w1p = f32(w1)                                            # (64, 8)
    w2p = f32(w2)                                            # (32, 64)
    whp = jnp.concatenate([f32(wq), f32(w3)], axis=0)        # (3, 32)

    pslab = jnp.zeros((H1, 8), jnp.float32)
    pslab = pslab.at[:, 0].set(f32(b1))
    pslab = pslab.at[:, 1].set(f32(g1))
    pslab = pslab.at[:, 2].set(f32(be1))
    pslab = pslab.at[:H2, 3].set(f32(b2))
    pslab = pslab.at[:H2, 4].set(f32(g2))
    pslab = pslab.at[:H2, 5].set(f32(be2))
    pslab = pslab.at[:HEADS, 6].set(jnp.concatenate([f32(bq), f32(b3)]))
    return (w1p, w2p, whp, pslab)


def model_forward(x, packed, block_b=8192):
    """x: (B, seq_len, state_space) or (B, state_space*seq_len); packed = pack_params(...)."""
    w1p, w2p, whp, pslab = packed

    # Feature-major input: batch rides the 128-lane axis.
    xT = x.reshape(-1, IN_DIM).astype(jnp.float32).T         # (8, B)
    B = xT.shape[1]
    bt = _choose_block(B, block_b)
    grid = (_cdiv(B, bt),)

    heads = pl.pallas_call(
        dueling_mlp_kernel,
        out_shape=jax.ShapeDtypeStruct((HEADS, B), jnp.float32),
        grid=grid,
        in_specs=[
            pl.BlockSpec((IN_DIM, bt), lambda i: (0, i)),     # x: streamed over batch
            pl.BlockSpec((H1, IN_DIM), lambda i: (0, 0)),     # w1: resident
            pl.BlockSpec((H2, H1), lambda i: (0, 0)),         # w2: resident
            pl.BlockSpec((HEADS, H2), lambda i: (0, 0)),      # fused head weight
            pl.BlockSpec((H1, 8), lambda i: (0, 0)),          # packed param slab
        ],
        out_specs=pl.BlockSpec((HEADS, bt), lambda i: (0, i)),
        compiler_params=pltpu.CompilerParams(
            dimension_semantics=("parallel",)),
        cost_estimate=pl.CostEstimate(
            flops=2 * B * (IN_DIM * H1 + H1 * H2 + H2 * HEADS),
            transcendentals=2 * B,
            bytes_accessed=4 * (B * IN_DIM + B * HEADS
                                + H1 * IN_DIM + H2 * H1 + HEADS * H2 + H1 * 8)),
    )(xT, w1p, w2p, whp, pslab)

    # torch.mean(action_vals) is a GLOBAL mean over all B*ACTION_SPACE elements;
    # it couples batch rows, so it stays in the wrapper (keeps the grid parallel).
    q = heads[:1, :]                                          # (1, B)
    av = heads[1:, :]                                         # (2, B)
    return (q + av - jnp.mean(av)).T                          # (B, 2)


def init_params(key):
    """Deterministic init matching the PyTorch module's parameter shapes."""
    ks = jax.random.split(key, 8)

    def lin_init(kw, kb, fan_in, fan_out):
        bound = 1.0 / jnp.sqrt(jnp.float32(fan_in))
        w = jax.random.uniform(kw, (fan_out, fan_in), jnp.float32, -bound, bound)
        b = jax.random.uniform(kb, (fan_out,), jnp.float32, -bound, bound)
        return w, b

    w1, b1 = lin_init(ks[0], ks[1], IN_DIM, H1)          # lin1: (64, 8)
    w2, b2 = lin_init(ks[2], ks[3], H1, H2)              # lin2: (32, 64)
    wq, bq = lin_init(ks[4], ks[5], H2, 1)               # q:    (1, 32)
    w3, b3 = lin_init(ks[6], ks[7], H2, ACTION_SPACE)    # lin3: (2, 32)

    g1 = jnp.ones((H1,), jnp.float32)
    be1 = jnp.zeros((H1,), jnp.float32)
    g2 = jnp.ones((H2,), jnp.float32)
    be2 = jnp.zeros((H2,), jnp.float32)

    return (w1, b1, g1, be1, w2, b2, g2, be2, wq, bq, w3, b3)


def _reference_forward(x, params):
    """Pure-JAX reference of the PyTorch forward, for sanity checking."""
    (w1, b1, g1, be1, w2, b2, g2, be2, wq, bq, w3, b3) = params
    xf = x.reshape(-1, IN_DIM).astype(jnp.float32)

    def ln(h, g, b):
        mu = jnp.mean(h, axis=-1, keepdims=True)
        var = jnp.mean((h - mu) ** 2, axis=-1, keepdims=True)
        return (h - mu) / jnp.sqrt(var + LN_EPS) * g + b

    h = jax.nn.relu(ln(xf @ w1.T + b1, g1, be1))
    h = jax.nn.relu(ln(h @ w2.T + b2, g2, be2))
    q = h @ wq.T + bq
    av = h @ w3.T + b3
    return q + av - jnp.mean(av)


if __name__ == "__main__":
    key = jax.random.PRNGKey(0)
    kx, kp = jax.random.split(key)
    params = init_params(kp)
    packed = pack_params(params)                               # one-time packing

    fwd = jax.jit(model_forward, static_argnames=("block_b",))

    # Small check (single block, full-extent lane dim).
    batch = 4
    x = jax.random.normal(kx, (batch, SEQ_LEN, STATE_SPACE), jnp.float32)
    out = jax.block_until_ready(fwd(x, packed))
    ref = _reference_forward(x, params)
    assert out.shape == (batch, ACTION_SPACE)
    assert jnp.allclose(out, ref, atol=1e-4, rtol=1e-4), (out, ref)

    # Larger, non-multiple-of-128 batch: 2 grid steps + masked partial last block.
    batch2 = 300
    x2 = jax.random.normal(kx, (batch2, SEQ_LEN, STATE_SPACE), jnp.float32)
    out2 = jax.block_until_ready(fwd(x2, packed))
    ref2 = _reference_forward(x2, params)
    assert out2.shape == (batch2, ACTION_SPACE)
    assert jnp.allclose(out2, ref2, atol=1e-4, rtol=1e-4)

    print("KERNEL_OK")
</pallas_src>

<mosaic_0001>
module attributes {stable_mosaic.version = 11 : i64} {
  func.func @dueling_mlp_kernel(%arg0: i32, %arg1: memref<8x4xf32, #tpu.memory_space<vmem>>, %arg2: memref<64x8xf32, #tpu.memory_space<vmem>>, %arg3: memref<32x64xf32, #tpu.memory_space<vmem>>, %arg4: memref<3x32xf32, #tpu.memory_space<vmem>>, %arg5: memref<64x8xf32, #tpu.memory_space<vmem>>, %arg6: memref<3x4xf32, #tpu.memory_space<vmem>>) attributes {dimension_semantics = [#tpu.dimension_semantics<parallel>], iteration_bounds = array<i64: 1>, scalar_prefetch = 0 : i64, scratch_operands = 0 : i64, tpu.core_type = #tpu.core_type<tc>, window_params = [{transform_indices = @transform_0, window_bounds = array<i64: 8, 4>}, {pipeline_mode = #tpu.pipeline_mode<synchronous>, transform_indices = @transform_1, window_bounds = array<i64: 64, 8>}, {pipeline_mode = #tpu.pipeline_mode<synchronous>, transform_indices = @transform_2, window_bounds = array<i64: 32, 64>}, {pipeline_mode = #tpu.pipeline_mode<synchronous>, transform_indices = @transform_3, window_bounds = array<i64: 3, 32>}, {pipeline_mode = #tpu.pipeline_mode<synchronous>, transform_indices = @transform_4, window_bounds = array<i64: 64, 8>}, {transform_indices = @transform_5, window_bounds = array<i64: 3, 4>}]} {
    %c0 = arith.constant 0 : index
    %c0_0 = arith.constant 0 : index
    %0 = vector.load %arg1[%c0, %c0_0] : memref<8x4xf32, #tpu.memory_space<vmem>>, vector<8x4xf32>
    %c0_1 = arith.constant 0 : index
    %c0_2 = arith.constant 0 : index
    %1 = vector.load %arg5[%c0_1, %c0_2] : memref<64x8xf32, #tpu.memory_space<vmem>>, vector<64x8xf32>
    %c0_3 = arith.constant 0 : index
    %c0_4 = arith.constant 0 : index
    %2 = vector.load %arg2[%c0_3, %c0_4] : memref<64x8xf32, #tpu.memory_space<vmem>>, vector<64x8xf32>
    %cst = arith.constant dense<0.000000e+00> : vector<64x4xf32>
    %3 = tpu.matmul %2, %0, %cst {dimension_numbers = #tpu.dot_dimension_numbers<[1], [0], [0], [1], [0, 0, 1, 1], [], []>} : vector<64x8xf32>, vector<8x4xf32>, vector<64x4xf32> -> vector<64x4xf32>
    %4 = vector.extract_strided_slice %1 {offsets = [0, 0], sizes = [64, 1], strides = [1, 1]} : vector<64x8xf32> to vector<64x1xf32>
    %5 = vector.broadcast %4 : vector<64x1xf32> to vector<64x4xf32>
    %6 = arith.addf %3, %5 : vector<64x4xf32>
    %7 = vector.extract_strided_slice %1 {offsets = [0, 1], sizes = [64, 1], strides = [1, 1]} : vector<64x8xf32> to vector<64x1xf32>
    %8 = vector.extract_strided_slice %1 {offsets = [0, 2], sizes = [64, 1], strides = [1, 1]} : vector<64x8xf32> to vector<64x1xf32>
    %cst_5 = arith.constant dense<0.000000e+00> : vector<4xf32>
    %9 = vector.multi_reduction <add>, %6, %cst_5 [0] : vector<64x4xf32> to vector<4xf32>
    %10 = vector.shape_cast %9 : vector<4xf32> to vector<1x4xf32>
    %cst_6 = arith.constant 6.400000e+01 : f32
    %11 = vector.broadcast %cst_6 : f32 to vector<1x4xf32>
    %12 = arith.divf %10, %11 : vector<1x4xf32>
    %13 = vector.broadcast %12 : vector<1x4xf32> to vector<64x4xf32>
    %14 = arith.subf %6, %13 : vector<64x4xf32>
    %15 = arith.mulf %14, %14 : vector<64x4xf32>
    %cst_7 = arith.constant dense<0.000000e+00> : vector<4xf32>
    %16 = vector.multi_reduction <add>, %15, %cst_7 [0] : vector<64x4xf32> to vector<4xf32>
    %17 = vector.shape_cast %16 : vector<4xf32> to vector<1x4xf32>
    %cst_8 = arith.constant 6.400000e+01 : f32
    %18 = vector.broadcast %cst_8 : f32 to vector<1x4xf32>
    %19 = arith.divf %17, %18 : vector<1x4xf32>
    %cst_9 = arith.constant 9.99999974E-6 : f32
    %20 = vector.broadcast %cst_9 : f32 to vector<1x4xf32>
    %21 = arith.addf %19, %20 : vector<1x4xf32>
    %22 = math.rsqrt %21 : vector<1x4xf32>
    %23 = vector.broadcast %22 : vector<1x4xf32> to vector<64x4xf32>
    %24 = arith.mulf %14, %23 : vector<64x4xf32>
    %25 = vector.broadcast %7 : vector<64x1xf32> to vector<64x4xf32>
    %26 = arith.mulf %24, %25 : vector<64x4xf32>
    %27 = vector.broadcast %8 : vector<64x1xf32> to vector<64x4xf32>
    %28 = arith.addf %26, %27 : vector<64x4xf32>
    %cst_10 = arith.constant 0.000000e+00 : f32
    %29 = vector.broadcast %cst_10 : f32 to vector<64x4xf32>
    %30 = arith.maximumf %28, %29 : vector<64x4xf32>
    %c0_11 = arith.constant 0 : index
    %c0_12 = arith.constant 0 : index
    %31 = vector.load %arg3[%c0_11, %c0_12] : memref<32x64xf32, #tpu.memory_space<vmem>>, vector<32x64xf32>
    %cst_13 = arith.constant dense<0.000000e+00> : vector<32x4xf32>
    %32 = tpu.matmul %31, %30, %cst_13 {dimension_numbers = #tpu.dot_dimension_numbers<[1], [0], [0], [1], [0, 0, 1, 1], [], []>} : vector<32x64xf32>, vector<64x4xf32>, vector<32x4xf32> -> vector<32x4xf32>
    %33 = vector.extract_strided_slice %1 {offsets = [0, 3], sizes = [32, 1], strides = [1, 1]} : vector<64x8xf32> to vector<32x1xf32>
    %34 = vector.broadcast %33 : vector<32x1xf32> to vector<32x4xf32>
    %35 = arith.addf %32, %34 : vector<32x4xf32>
    %36 = vector.extract_strided_slice %1 {offsets = [0, 4], sizes = [32, 1], strides = [1, 1]} : vector<64x8xf32> to vector<32x1xf32>
    %37 = vector.extract_strided_slice %1 {offsets = [0, 5], sizes = [32, 1], strides = [1, 1]} : vector<64x8xf32> to vector<32x1xf32>
    %cst_14 = arith.constant dense<0.000000e+00> : vector<4xf32>
    %38 = vector.multi_reduction <add>, %35, %cst_14 [0] : vector<32x4xf32> to vector<4xf32>
    %39 = vector.shape_cast %38 : vector<4xf32> to vector<1x4xf32>
    %cst_15 = arith.constant 3.200000e+01 : f32
    %40 = vector.broadcast %cst_15 : f32 to vector<1x4xf32>
    %41 = arith.divf %39, %40 : vector<1x4xf32>
    %42 = vector.broadcast %41 : vector<1x4xf32> to vector<32x4xf32>
    %43 = arith.subf %35, %42 : vector<32x4xf32>
    %44 = arith.mulf %43, %43 : vector<32x4xf32>
    %cst_16 = arith.constant dense<0.000000e+00> : vector<4xf32>
    %45 = vector.multi_reduction <add>, %44, %cst_16 [0] : vector<32x4xf32> to vector<4xf32>
    %46 = vector.shape_cast %45 : vector<4xf32> to vector<1x4xf32>
    %cst_17 = arith.constant 3.200000e+01 : f32
    %47 = vector.broadcast %cst_17 : f32 to vector<1x4xf32>
    %48 = arith.divf %46, %47 : vector<1x4xf32>
    %cst_18 = arith.constant 9.99999974E-6 : f32
    %49 = vector.broadcast %cst_18 : f32 to vector<1x4xf32>
    %50 = arith.addf %48, %49 : vector<1x4xf32>
    %51 = math.rsqrt %50 : vector<1x4xf32>
    %52 = vector.broadcast %51 : vector<1x4xf32> to vector<32x4xf32>
    %53 = arith.mulf %43, %52 : vector<32x4xf32>
    %54 = vector.broadcast %36 : vector<32x1xf32> to vector<32x4xf32>
    %55 = arith.mulf %53, %54 : vector<32x4xf32>
    %56 = vector.broadcast %37 : vector<32x1xf32> to vector<32x4xf32>
    %57 = arith.addf %55, %56 : vector<32x4xf32>
    %cst_19 = arith.constant 0.000000e+00 : f32
    %58 = vector.broadcast %cst_19 : f32 to vector<32x4xf32>
    %59 = arith.maximumf %57, %58 : vector<32x4xf32>
    %c0_20 = arith.constant 0 : index
    %c0_21 = arith.constant 0 : index
    %60 = vector.load %arg4[%c0_20, %c0_21] : memref<3x32xf32, #tpu.memory_space<vmem>>, vector<3x32xf32>
    %cst_22 = arith.constant dense<0.000000e+00> : vector<3x4xf32>
    %61 = tpu.matmul %60, %59, %cst_22 {dimension_numbers = #tpu.dot_dimension_numbers<[1], [0], [0], [1], [0, 0, 1, 1], [], []>} : vector<3x32xf32>, vector<32x4xf32>, vector<3x4xf32> -> vector<3x4xf32>
    %62 = vector.extract_strided_slice %1 {offsets = [0, 6], sizes = [3, 1], strides = [1, 1]} : vector<64x8xf32> to vector<3x1xf32>
    %63 = vector.broadcast %62 : vector<3x1xf32> to vector<3x4xf32>
    %64 = arith.addf %61, %63 : vector<3x4xf32>
    %c0_23 = arith.constant 0 : index
    %c0_24 = arith.constant 0 : index
    %65 = vector.load %arg6[%c0_23, %c0_24] : memref<3x4xf32, #tpu.memory_space<vmem>>, vector<3x4xf32>
    tpu.vector_store %arg6[%c0_23, %c0_24], %64 {strides = array<i32>} : memref<3x4xf32, #tpu.memory_space<vmem>>, vector<3x4xf32>,
    return
  }
  func.func @transform_0(%arg0: i32) -> (i32, i32) {
    %c0_i32 = arith.constant 0 : i32
    %c0_i32_0 = arith.constant 0 : i32
    return %c0_i32, %arg0 : i32, i32
  }
  func.func @transform_1(%arg0: i32) -> (i32, i32) {
    %c0_i32 = arith.constant 0 : i32
    %c0_i32_0 = arith.constant 0 : i32
    %c0_i32_1 = arith.constant 0 : i32
    return %c0_i32, %c0_i32_0 : i32, i32
  }
  func.func @transform_2(%arg0: i32) -> (i32, i32) {
    %c0_i32 = arith.constant 0 : i32
    %c0_i32_0 = arith.constant 0 : i32
    %c0_i32_1 = arith.constant 0 : i32
    return %c0_i32, %c0_i32_0 : i32, i32
  }
  func.func @transform_3(%arg0: i32) -> (i32, i32) {
    %c0_i32 = arith.constant 0 : i32
    %c0_i32_0 = arith.constant 0 : i32
    %c0_i32_1 = arith.constant 0 : i32
    return %c0_i32, %c0_i32_0 : i32, i32
  }
  func.func @transform_4(%arg0: i32) -> (i32, i32) {
    %c0_i32 = arith.constant 0 : i32
    %c0_i32_0 = arith.constant 0 : i32
    %c0_i32_1 = arith.constant 0 : i32
    return %c0_i32, %c0_i32_0 : i32, i32
  }
  func.func @transform_5(%arg0: i32) -> (i32, i32) {
    %c0_i32 = arith.constant 0 : i32
    %c0_i32_0 = arith.constant 0 : i32
    return %c0_i32, %arg0 : i32, i32
  }
}

</mosaic_0001>

<bundles_post_ra>
// kernel: model_forward.1
= control target key start
LH: loop header
LB: loop body
LE: loop exit
PB: predicated region body
PF: predicated region fallthrough
CT: control target
= control target key end

     0   :  { %vm77_vm0 = vcmask 64512   ;;  %v772_v3 = vmov 0   ;;  %v773_v18 = vmov 1   ;;  %v774_v19 = vmov 2   ;;  %s964_s0 = inlined_call_operand.vmem [shape: f32[8,4], index: 0, kind: input, shape index: {}]   ;;  %s965_s1 = inlined_call_operand.vmem [shape: f32[64,8], index: 1, kind: input, shape index: {}]   ;;  %s966_s4 = inlined_call_operand.vmem [shape: f32[64,8], index: 4, kind: input, shape index: {}]   ;;  %s967_s2 = inlined_call_operand.vmem [shape: f32[32,64], index: 2, kind: input, shape index: {}]   ;;  %s968_s3 = inlined_call_operand.vmem [shape: f32[3,32], index: 3, kind: input, shape index: {}]   ;;  %s969_s5 = inlined_call_operand.vmem [shape: f32[3,4], index: 5, kind: output, shape index: {}]  }
   0x1   :  { %v20_v0 = vld [vmem:[%s964_s0] sm:$0xff]  ;;  %v30_v2 = vld [vmem:[%s965_s1 + $0x8] sm:$0xff]  ;;  %752 = vset.pattern.permute.xlu0 %v772_v3  ;;  %753 = vset.pattern.permute.xlu1 %v772_v3  ;;  %v31_v4 = vld [vmem:[%s965_s1 + $0x10] sm:$0xff]  ;;  %vm387_vm1 = vcmask 523264   ;;  %v775_v21 = vmov 3   ;;  %v776_v22 = vmov 4  }
   0x2   :  { %v29_v1 = vld [vmem:[%s965_s1] sm:$0xff]  ;;  %696 = vmatprep.subr.mxu0 %v20_v0  ;;  %v833_v6 = vld [vmem:[%s966_s4 + $0x10] sm:$0xff]  ;;  %v32_v7 = vld [vmem:[%s965_s1 + $0x18] sm:$0xff]  ;;  %v777_v25 = vmov 5   ;;  %vm207_vm2 = vcmask 31744   ;;  %vm779_vm3 = vmmov 0  }
   0x3   :  { %698 = vmatprep.mubr.msk.f32.mxu0 %vm77_vm0, %v29_v1  ;;  %697 = vmatpush3.msra.mxu0 %v20_v0  ;;  %v828_v5 = vld [vmem:[%s966_s4] sm:$0xff]  ;;  %v847_v9 = vld [vmem:[%s966_s4 + $0x8] sm:$0xff]  ;;  %v852_v10 = vld [vmem:[%s966_s4 + $0x18] sm:$0xff]  ;;  %vm577_vm4 = vcmask 261120   ;;  %vm651_vm5 = vcmask 26624  }
   0x4   :  { %699 = vmatmul.mubr.msk.f32.vlgmr.msra.gmra.mxu0 %vm77_vm0, %v30_v2  ;;  %39 = vperm.xlu0 %752, %v828_v5   ;;  %v33_v8 = vld [vmem:[%s965_s1 + $0x20] sm:$0xff]  ;;  %v34_v11 = vld [vmem:[%s965_s1 + $0x28] sm:$0xff]  ;;  %v35_v12 = vld [vmem:[%s965_s1 + $0x30] sm:$0xff] }
   0x5   :  { %701 = vmatprep.mubr.msk.f32.mxu0 %vm77_vm0, %v31_v4  ;;  %49 = vperm.xlu1 %753, %v833_v6   ;;  %v25_v13 = vld [vmem:[%s966_s4 + $0x20] sm:$0xff]  ;;  %v26_v14 = vld [vmem:[%s966_s4 + $0x28] sm:$0xff]  ;;  %v36_v15 = vld [vmem:[%s965_s1 + $0x38] sm:$0xff] }
   0x6   :  { %v27_v16 = vld [vmem:[%s966_s4 + $0x30] sm:$0xff]  ;;  %v28_v17 = vld [vmem:[%s966_s4 + $0x38] sm:$0xff]  ;;  %v367_v20 = vld [vmem:[%s967_s2] sm:$0xff] }
   0x7   :  { %726 = vmatprep.mubr.msk.f32.mxu1 %vm387_vm1, %v367_v20 }
   0x8   :  { %702 = vmatmul.mubr.msk.f32.gmra.mxu0 %vm77_vm0, %v32_v7  ;;  %44 = vperm.xlu0 %752, %v847_v9  }
   0x9   :  { %704 = vmatprep.mubr.msk.f32.mxu0 %vm77_vm0, %v33_v8  ;;  %54 = vperm.xlu1 %753, %v852_v10  }
   0xc   :  { %705 = vmatmul.mubr.msk.f32.gmra.mxu0 %vm77_vm0, %v34_v11  ;;  %59 = vperm.xlu0 %752, %v25_v13  }
   0xd   :  { %707 = vmatprep.mubr.msk.f32.mxu0 %vm77_vm0, %v35_v12  ;;  %64 = vperm.xlu1 %753, %v26_v14  }
  0x10   :  { %708 = vmatmul.mubr.msk.f32.gmra.mxu0 %vm77_vm0, %v36_v15  ;;  %69 = vperm.xlu0 %752, %v27_v16  }
  0x11   :  { %74 = vperm.xlu1 %753, %v28_v17  }
  0x14   :  { %754 = vset.pattern.permute.xlu0 %v773_v18 }
  0x15   :  { %755 = vset.pattern.permute.xlu1 %v773_v18  ;;  %308 = vperm.xlu0 %754, %v28_v17  }
  0x16   :  { %304 = vperm.xlu1 %755, %v27_v16  }
  0x19   :  { %300 = vperm.xlu0 %754, %v26_v14  }
  0x1a   :  { %756 = vset.pattern.permute.xlu1 %v774_v19 }
  0x1b   :  { %348 = vperm.xlu1 %756, %v28_v17  }
  0x1d   :  { %296 = vperm.xlu0 %754, %v25_v13  }
  0x1f   :  { %344 = vperm.xlu1 %756, %v27_v16  }
  0x21   :  { %292 = vperm.xlu0 %754, %v852_v10  }
  0x23   :  { %340 = vperm.xlu1 %756, %v26_v14  }
  0x25   :  { %288 = vperm.xlu0 %754, %v833_v6  }
  0x27   :  { %336 = vperm.xlu1 %756, %v25_v13  }
  0x29   :  { %284 = vperm.xlu0 %754, %v847_v9  }
  0x2b   :  { %332 = vperm.xlu1 %756, %v852_v10  }
  0x2d   :  { %280 = vperm.xlu0 %754, %v828_v5  }
  0x2f   :  { %328 = vperm.xlu1 %756, %v833_v6  }
  0x31   :  { %757 = vset.pattern.permute.xlu0 %v774_v19 }
  0x32   :  { %320 = vperm.xlu0 %757, %v828_v5  }
  0x33   :  { %324 = vperm.xlu1 %756, %v847_v9  }
  0x36   :  { %759 = vset.pattern.permute.xlu0 %v775_v21 }
  0x37   :  { %758 = vset.pattern.permute.xlu1 %v775_v21  ;;  %380 = vperm.xlu0 %759, %v833_v6  }
  0x38   :  { %372 = vperm.xlu1 %758, %v828_v5  }
  0x3b   :  { %761 = vset.pattern.permute.xlu0 %v776_v22 }
  0x3c   :  { %376 = vperm.xlu1 %758, %v847_v9   ;;  %537 = vperm.xlu0 %761, %v833_v6  }
  0x40   :  { %384 = vperm.xlu1 %758, %v852_v10   ;;  %764 = vset.pattern.permute.xlu0 %v777_v25 }
  0x41   :  { %557 = vperm.xlu0 %764, %v833_v6  }
  0x44   :  { %760 = vset.pattern.permute.xlu1 %v776_v22 }
  0x45   :  { %541 = vperm.xlu1 %760, %v852_v10   ;;  %549 = vperm.xlu0 %764, %v828_v5  }
  0x49   :  { %762 = vset.pattern.permute.xlu1 %v777_v25 }
  0x4a   :  { %561 = vperm.xlu1 %762, %v852_v10  }
  0x4e   :  { %763 = vset.pattern.permute.xlu1 %v776_v22 }
  0x4f   :  { %533 = vperm.xlu1 %763, %v847_v9  }
  0x53   :  { %529 = vperm.xlu1 %763, %v828_v5  }
  0x57   :  { %765 = vset.pattern.permute.xlu1 %v777_v25 }
  0x58   :  { %553 = vperm.xlu1 %765, %v847_v9  }
  0x7f   :  { %v40_v23 = vpop.permute.xlu0 %39 }
  0x80   :  { %v50_v24 = vpop.permute.xlu1 %49 }
  0x83   :  { %v45_v27 = vpop.permute.xlu0 %44 }
  0x84   :  { %v55_v28 = vpop.permute.xlu1 %54 }
  0x87   :  { %v60_v35 = vpop.permute.xlu0 %59 }
  0x88   :  { %v65_v39 = vpop.permute.xlu1 %64 }
  0x8b   :  { %v70_v50 = vpop.permute.xlu0 %69 }
  0x8c   :  { %v75_v52 = vpop.permute.xlu1 %74 }
  0xc4   :  { %v700_v26 = vpop.f32.mrf.mxu0 }
  0xc5   :  { %v174_v30 = vadd.f32 %v700_v26, %v45_v27 }
  0xc6   :  { %v168_v29 = vpop.f32.mrf.mxu0 }
  0xc7   :  { %v169_v31 = vadd.f32 %v168_v29, %v40_v23  ;;  %v209_v36 = vsel %vm207_vm2, %v174_v30, 0.0 }
  0xc8   :  { %v703_v32 = vpop.f32.mrf.mxu0 }
  0xc9   :  { %v208_v33 = vsel %vm207_vm2, %v169_v31, 0.0  ;;  %v184_v37 = vadd.f32 %v703_v32, %v55_v28 }
  0xca   :  { %v178_v34 = vpop.f32.mrf.mxu0  ;;  %v210_v40 = vadd.f32 %v209_v36, %v208_v33 }
  0xcb   :  { %v179_v38 = vadd.f32 %v178_v34, %v50_v24  ;;  %v213_v45 = vsel %vm207_vm2, %v184_v37, 0.0 }
  0xcc   :  { %v706_v41 = vpop.f32.mrf.mxu0 }
  0xcd   :  { %v211_v42 = vsel %vm207_vm2, %v179_v38, 0.0  ;;  %v194_v46 = vadd.f32 %v706_v41, %v65_v39  ;;  %v305_v39 = vpop.permute.xlu1 %304  ;;  %v309_v41 = vpop.permute.xlu0 %308 }
  0xce   :  { %v212_v43 = vadd.f32 %v211_v42, %v210_v40  ;;  %v188_v44 = vpop.f32.mrf.mxu0 }
  0xcf   :  { %v189_v47 = vadd.f32 %v188_v44, %v60_v35  ;;  %v217_v55 = vsel %vm207_vm2, %v194_v46, 0.0 }
  0xd0   :  { %v214_v48 = vadd.f32 %v213_v45, %v212_v43  ;;  %v709_v49 = vpop.f32.mrf.mxu0 }
  0xd1   :  { %v215_v51 = vsel %vm207_vm2, %v189_v47, 0.0  ;;  %v204_v56 = vadd.f32 %v709_v49, %v75_v52  ;;  %v349_v44 = vpop.permute.xlu1 %348 }
  0xd2   :  { %v216_v53 = vadd.f32 %v215_v51, %v214_v48  ;;  %v198_v54 = vpop.f32.mrf.mxu0 }
  0xd3   :  { %v199_v57 = vadd.f32 %v198_v54, %v70_v50  ;;  %v221_v61 = vsel %vm207_vm2, %v204_v56, 0.0 }
  0xd4   :  { %v218_v58 = vadd.f32 %v217_v55, %v216_v53 }
  0xd5   :  { %v219_v59 = vsel %vm207_vm2, %v199_v57, 0.0  ;;  %v345_v49 = vpop.permute.xlu1 %344 }
  0xd6   :  { %v220_v60 = vadd.f32 %v219_v59, %v218_v58 }
  0xd8   :  { %v222_v62 = vadd.f32 %v221_v61, %v220_v60 }
  0xd9   :  { %v341_v52 = vpop.permute.xlu1 %340 }
  0xda   :  { %v223_v63 = vrot.slane %v222_v62, 4 }
  0xdc   :  { %v224_v0 = vadd.f32 %v223_v63, %v222_v62 }
  0xdd   :  { %v337_v54 = vpop.permute.xlu1 %336 }
  0xde   :  { %v225_v1 = vrot.slane %v224_v0, 2 }
  0xe0   :  { %v226_v2 = vadd.f32 %v225_v1, %v224_v0 }
  0xe1   :  { %v333_v61 = vpop.permute.xlu1 %332 }
  0xe2   :  { %v227_v3 = vrot.slane %v226_v2, 1 }
  0xe4   :  { %v228_v4 = vadd.f32 %v227_v3, %v226_v2 }
  0xe6   :  { %v230_v6 = vmul.f32 0.015625, %v228_v4 }
  0xe8   :  { %v914_v7 = vsub.f32 %v169_v31, %v230_v6  ;;  %v916_v8 = vsub.f32 %v174_v30, %v230_v6  ;;  %v233_v10 = vsub.f32 %v179_v38, %v230_v6  ;;  %v234_v11 = vsub.f32 %v184_v37, %v230_v6 }
  0xe9   :  { %v235_v12 = vsub.f32 %v189_v47, %v230_v6  ;;  %v236_v15 = vsub.f32 %v194_v46, %v230_v6  ;;  %v237_v20 = vsub.f32 %v199_v57, %v230_v6  ;;  %v238_v24 = vsub.f32 %v204_v56, %v230_v6  ;;  %v301_v46 = vpop.permute.xlu0 %300 }
  0xea   :  { %v239_v13 = vmul.f32 %v914_v7, %v914_v7  ;;  %v240_v9 = vmul.f32 %v916_v8, %v916_v8  ;;  %v241_v14 = vmul.f32 %v233_v10, %v233_v10  ;;  %v242_v16 = vmul.f32 %v234_v11, %v234_v11 }
  0xeb   :  { %v243_v21 = vmul.f32 %v235_v12, %v235_v12  ;;  %v244_v25 = vmul.f32 %v236_v15, %v236_v15  ;;  %v245_v28 = vmul.f32 %v237_v20, %v237_v20  ;;  %v246_v31 = vmul.f32 %v238_v24, %v238_v24 }
  0xec   :  { %v247_v17 = vsel %vm207_vm2, %v239_v13, 0.0  ;;  %v248_v18 = vsel %vm207_vm2, %v240_v9, 0.0  ;;  %v250_v22 = vsel %vm207_vm2, %v241_v14, 0.0  ;;  %v252_v26 = vsel %vm207_vm2, %v242_v16, 0.0 }
  0xed   :  { %v249_v19 = vadd.f32 %v248_v18, %v247_v17  ;;  %v254_v29 = vsel %vm207_vm2, %v243_v21, 0.0  ;;  %v256_v32 = vsel %vm207_vm2, %v244_v25, 0.0  ;;  %v258_v34 = vsel %vm207_vm2, %v245_v28, 0.0  ;;  %v297_v51 = vpop.permute.xlu0 %296  ;;  %v329_v18 = vpop.permute.xlu1 %328 }
  0xee   :  { %v260_v36 = vsel %vm207_vm2, %v246_v31, 0.0 }
  0xef   :  { %v251_v23 = vadd.f32 %v250_v22, %v249_v19 }
  0xf1   :  { %v253_v27 = vadd.f32 %v252_v26, %v251_v23  ;;  %v293_v53 = vpop.permute.xlu0 %292  ;;  %v325_v26 = vpop.permute.xlu1 %324 }
  0xf3   :  { %v255_v30 = vadd.f32 %v254_v29, %v253_v27 }
  0xf5   :  { %v257_v33 = vadd.f32 %v256_v32, %v255_v30  ;;  %v289_v55 = vpop.permute.xlu0 %288  ;;  %v368_v32 = vld [vmem:[%s967_s2 + $0x8] sm:$0xff] }
  0xf7   :  { %v259_v35 = vadd.f32 %v258_v34, %v257_v33  ;;  %v369_v33 = vld [vmem:[%s967_s2 + $0x10] sm:$0xff]  ;;  %v370_v34 = vld [vmem:[%s967_s2 + $0x18] sm:$0xff] }
  0xf9   :  { %v261_v37 = vadd.f32 %v260_v36, %v259_v35  ;;  %v285_v2 = vpop.permute.xlu0 %284  ;;  %v778_v35 = vmov 0.0   ;;  %v780_v36 = vmov 6  }
  0xfa   :  { %732 = vmatprep.subr.mxu0 %v778_v35  ;;  %740 = vmatprep.mubr.msk.f32.mxu0 %vm779_vm3, %v778_v35 }
  0xfb   :  { %v262_v38 = vrot.slane %v261_v37, 4  ;;  %766 = vset.pattern.permute.xlu1 %v780_v36  ;;  %767 = vset.pattern.permute.xlu0 %v780_v36 }
  0xfc   :  { %574 = vperm.xlu1 %766, %v828_v5  }
  0xfd   :  { %v263_v40 = vadd.f32 %v262_v38, %v261_v37  ;;  %v281_v21 = vpop.permute.xlu0 %280  ;;  %v373_v37 = vpop.permute.xlu1 %372 }
  0xff   :  { %v264_v42 = vrot.slane %v263_v40, 2 }
 0x101   :  { %v265_v43 = vadd.f32 %v264_v42, %v263_v40  ;;  %v377_v38 = vpop.permute.xlu1 %376 }
 0x103   :  { %v266_v45 = vrot.slane %v265_v43, 1 }
 0x105   :  { %v267_v47 = vadd.f32 %v266_v45, %v265_v43 }
 0x107   :  { %v268_v48 = vmul.f32 0.015625, %v267_v47 }
 0x109   :  { %v269_v50 = vadd.f32 1e-05, %v268_v48 }
 0x10b   :  { %768 = vrsqrt.f32 %v269_v50 }
 0x118   :  { %v769_v56 = vpop.eup %768 }
 0x119   :  { %v277_v57 = vmul.f32 %v769_v56, %v237_v20  ;;  %v278_v58 = vmul.f32 %v769_v56, %v238_v24  ;;  %v276_v59 = vmul.f32 %v769_v56, %v236_v15  ;;  %v275_v60 = vmul.f32 %v769_v56, %v235_v12 }
 0x11a   :  { %v274_v1 = vmul.f32 %v769_v56, %v234_v11  ;;  %v273_v13 = vmul.f32 %v769_v56, %v233_v10  ;;  %v272_v17 = vmul.f32 %v769_v56, %v916_v8  ;;  %v271_v12 = vmul.f32 %v769_v56, %v914_v7  ;;  %v321_v8 = vpop.permute.xlu0 %320 }
 0x11b   :  { %v317_v62 = vmul.f32 %v305_v39, %v277_v57  ;;  %v318_v63 = vmul.f32 %v309_v41, %v278_v58  ;;  %v316_v0 = vmul.f32 %v301_v46, %v276_v59  ;;  %v315_v6 = vmul.f32 %v297_v51, %v275_v60  ;;  %v385_v46 = vpop.permute.xlu1 %384 }
 0x11c   :  { %v314_v16 = vmul.f32 %v293_v53, %v274_v1  ;;  %v313_v15 = vmul.f32 %v289_v55, %v273_v13  ;;  %v312_v23 = vmul.f32 %v285_v2, %v272_v17  ;;  %v311_v25 = vmul.f32 %v281_v21, %v271_v12 }
 0x11d   :  { %v358_v3 = vadd.f32 %v349_v44, %v318_v63  ;;  %v357_v4 = vadd.f32 %v345_v49, %v317_v62  ;;  %v356_v14 = vadd.f32 %v341_v52, %v316_v0  ;;  %v355_v20 = vadd.f32 %v337_v54, %v315_v6 }
 0x11e   :  { %v354_v22 = vadd.f32 %v333_v61, %v314_v16  ;;  %v353_v24 = vadd.f32 %v329_v18, %v313_v15  ;;  %v352_v28 = vadd.f32 %v325_v26, %v312_v23  ;;  %v351_v29 = vadd.f32 %v321_v8, %v311_v25  ;;  %v381_v44 = vpop.permute.xlu0 %380 }
 0x11f   :  { %v366_v9 = vmax.f32 %v358_v3, 0.0  ;;  %v365_v19 = vmax.f32 %v357_v4, 0.0  ;;  %v364_v11 = vmax.f32 %v356_v14, 0.0  ;;  %v363_v10 = vmax.f32 %v355_v20, 0.0 }
 0x120   :  { %v362_v27 = vmax.f32 %v354_v22, 0.0  ;;  %v361_v7 = vmax.f32 %v353_v24, 0.0  ;;  %v360_v30 = vmax.f32 %v352_v28, 0.0  ;;  %v359_v31 = vmax.f32 %v351_v29, 0.0  ;;  %v542_v22 = vpop.permute.xlu1 %541 }
 0x121   :  { %710 = vmatprep.subr.mxu1 %v366_v9 }
 0x122   :  { %711 = vmatpush3.msra.mxu1 %v366_v9  ;;  %v538_v8 = vpop.permute.xlu0 %537 }
 0x123   :  { %712 = vmatprep.subr.mxu1 %v365_v19 }
 0x124   :  { %713 = vmatpush3.msra.mxu1 %v365_v19  ;;  %v562_v25 = vpop.permute.xlu1 %561 }
 0x125   :  { %714 = vmatprep.subr.mxu1 %v364_v11 }
 0x126   :  { %715 = vmatpush3.msra.mxu1 %v364_v11 }
 0x127   :  { %716 = vmatprep.subr.mxu1 %v363_v10 }
 0x128   :  { %717 = vmatpush3.msra.mxu1 %v363_v10  ;;  %v534_v26 = vpop.permute.xlu1 %533 }
 0x129   :  { %718 = vmatprep.subr.mxu1 %v362_v27 }
 0x12a   :  { %719 = vmatpush3.msra.mxu1 %v362_v27 }
 0x12b   :  { %720 = vmatprep.subr.mxu1 %v361_v7 }
 0x12c   :  { %721 = vmatpush3.msra.mxu1 %v361_v7  ;;  %v530_v27 = vpop.permute.xlu1 %529  ;;  %v558_v7 = vpop.permute.xlu0 %557 }
 0x12d   :  { %722 = vmatprep.subr.mxu1 %v360_v30 }
 0x12e   :  { %723 = vmatpush3.msra.mxu1 %v360_v30 }
 0x12f   :  { %724 = vmatprep.subr.mxu1 %v359_v31 }
 0x130   :  { %725 = vmatpush3.msra.mxu1 %v359_v31 }
 0x131   :  { %727 = vmatmul.mubr.msk.f32.vlgmr.msra.gmra.mxu1 %vm387_vm1, %v368_v32 }
 0x132   :  { %729 = vmatprep.mubr.msk.f32.mxu1 %vm387_vm1, %v369_v33 }
 0x135   :  { %730 = vmatmul.mubr.msk.f32.gmra.mxu1 %vm387_vm1, %v370_v34 }
 0x1f1   :  { %v728_v39 = vpop.f32.mrf.mxu1 }
 0x1f2   :  { %v472_v41 = vadd.f32 %v728_v39, %v377_v38 }
 0x1f3   :  { %v466_v40 = vpop.f32.mrf.mxu1 }
 0x1f4   :  { %v467_v42 = vadd.f32 %v466_v40, %v373_v37  ;;  %v486_v48 = vsel %vm207_vm2, %v472_v41, 0.0  ;;  %v554_v37 = vpop.permute.xlu1 %553 }
 0x1f5   :  { %v731_v43 = vpop.f32.mrf.mxu1 }
 0x1f6   :  { %v485_v45 = vsel %vm207_vm2, %v467_v42, 0.0  ;;  %v482_v49 = vadd.f32 %v731_v43, %v385_v46 }
 0x1f7   :  { %v476_v47 = vpop.f32.mrf.mxu1  ;;  %v487_v51 = vadd.f32 %v486_v48, %v485_v45  ;;  %v572_v48 = vld [vmem:[%s968_s3] sm:$0x7] }
 0x1f8   :  { %v477_v50 = vadd.f32 %v476_v47, %v381_v44  ;;  %v490_v53 = vsel %vm207_vm2, %v482_v49, 0.0 }
 0x1fa   :  { %v488_v52 = vsel %vm207_vm2, %v477_v50, 0.0 }
 0x1fb   :  { %v489_v5 = vadd.f32 %v488_v52, %v487_v51 }
 0x1fd   :  { %v491_v54 = vadd.f32 %v490_v53, %v489_v5 }
 0x1ff   :  { %v492_v55 = vrot.slane %v491_v54, 4 }
 0x201   :  { %v493_v56 = vadd.f32 %v492_v55, %v491_v54 }
 0x203   :  { %v494_v57 = vrot.slane %v493_v56, 2 }
 0x205   :  { %v495_v58 = vadd.f32 %v494_v57, %v493_v56 }
 0x207   :  { %v496_v59 = vrot.slane %v495_v58, 1 }
 0x209   :  { %v497_v60 = vadd.f32 %v496_v59, %v495_v58 }
 0x20b   :  { %v499_v61 = vmul.f32 0.03125, %v497_v60 }
 0x20d   :  { %v500_v62 = vsub.f32 %v467_v42, %v499_v61  ;;  %v501_v63 = vsub.f32 %v472_v41, %v499_v61  ;;  %v502_v0 = vsub.f32 %v477_v50, %v499_v61  ;;  %v503_v1 = vsub.f32 %v482_v49, %v499_v61  ;;  %v550_v41 = vpop.permute.xlu0 %549  ;;  %v575_v49 = vpop.permute.xlu1 %574 }
 0x20f   :  { %v504_v2 = vmul.f32 %v500_v62, %v500_v62  ;;  %v505_v3 = vmul.f32 %v501_v63, %v501_v63  ;;  %v506_v4 = vmul.f32 %v502_v0, %v502_v0  ;;  %v507_v9 = vmul.f32 %v503_v1, %v503_v1 }
 0x211   :  { %v508_v6 = vsel %vm207_vm2, %v504_v2, 0.0  ;;  %v509_v13 = vsel %vm207_vm2, %v505_v3, 0.0  ;;  %v511_v16 = vsel %vm207_vm2, %v506_v4, 0.0  ;;  %v513_v18 = vsel %vm207_vm2, %v507_v9, 0.0 }
 0x212   :  { %v510_v14 = vadd.f32 %v509_v13, %v508_v6 }
 0x214   :  { %v512_v17 = vadd.f32 %v511_v16, %v510_v14 }
 0x216   :  { %v514_v19 = vadd.f32 %v513_v18, %v512_v17 }
 0x218   :  { %v515_v20 = vrot.slane %v514_v19, 4 }
 0x21a   :  { %v516_v15 = vadd.f32 %v515_v20, %v514_v19 }
 0x21c   :  { %v517_v12 = vrot.slane %v516_v15, 2 }
 0x21e   :  { %v518_v21 = vadd.f32 %v517_v12, %v516_v15 }
 0x220   :  { %v519_v11 = vrot.slane %v518_v21, 1 }
 0x222   :  { %v520_v23 = vadd.f32 %v519_v11, %v518_v21 }
 0x224   :  { %v521_v10 = vmul.f32 0.03125, %v520_v23 }
 0x226   :  { %v522_v24 = vadd.f32 1e-05, %v521_v10 }
 0x228   :  { %770 = vrsqrt.f32 %v522_v24 }
 0x235   :  { %v771_v28 = vpop.eup %770 }
 0x236   :  { %v527_v29 = vmul.f32 %v771_v28, %v503_v1  ;;  %v525_v30 = vmul.f32 %v771_v28, %v501_v63  ;;  %v526_v31 = vmul.f32 %v771_v28, %v502_v0  ;;  %v524_v32 = vmul.f32 %v771_v28, %v500_v62 }
 0x238   :  { %v547_v33 = vmul.f32 %v542_v22, %v527_v29  ;;  %v545_v34 = vmul.f32 %v534_v26, %v525_v30  ;;  %v546_v36 = vmul.f32 %v538_v8, %v526_v31  ;;  %v544_v39 = vmul.f32 %v530_v27, %v524_v32 }
 0x23a   :  { %v567_v38 = vadd.f32 %v562_v25, %v547_v33  ;;  %v566_v40 = vadd.f32 %v558_v7, %v546_v36  ;;  %v565_v43 = vadd.f32 %v554_v37, %v545_v34  ;;  %v564_v45 = vadd.f32 %v550_v41, %v544_v39 }
 0x23c   :  { %v571_v42 = vmax.f32 %v567_v38, 0.0  ;;  %v570_v44 = vmax.f32 %v566_v40, 0.0  ;;  %v569_v46 = vmax.f32 %v565_v43, 0.0  ;;  %v568_v47 = vmax.f32 %v564_v45, 0.0 }
 0x23e   :  { %733 = vmatpush3.msra.mxu0 %v571_v42 }
 0x23f   :  { %734 = vmatprep.subr.mxu0 %v778_v35 }
 0x240   :  { %735 = vmatpush3.msra.mxu0 %v570_v44 }
 0x241   :  { %736 = vmatprep.subr.mxu0 %v778_v35 }
 0x242   :  { %737 = vmatpush3.msra.mxu0 %v569_v46 }
 0x243   :  { %738 = vmatprep.subr.mxu0 %v778_v35 }
 0x244   :  { %739 = vmatpush3.msra.mxu0 %v568_v47 }
 0x245   :  { %741 = vmatmul.mubr.msk.f32.vlgmr.msra.gmra.mxu0 %vm577_vm4, %v572_v48 }
 0x305   :  { %v647_v50 = vpop.f32.mrf.mxu0 }
 0x306   :  { %v648_v51 = vadd.f32 %v647_v50, %v575_v49 }
 0x307   :  { %v742_v52 = vpop.f32.mrf.mxu0 }
 0x308   :  { %652 = vst.msk [vmem:[%s969_s5] sm:$0x7] %vm651_vm5, %v648_v51 }

</bundles_post_ra>
